<compile_context>
chip_gen: v7x
topology: tpu7x:2x2x1
jax: 0.10.0
libtpu: 0.0.40
codegen_flags: <defaults>
</compile_context>

<pallas_src>
import math
import jax
import jax.numpy as jnp
from jax.experimental import pallas as pl
from jax.experimental.pallas import tpu as pltpu
from typing import NamedTuple


_C_GELU = 0.7978845608028654            # sqrt(2/pi)
_C_GELU3 = _C_GELU * 0.044715


def _round_up(x, m):
    return (x + m - 1) // m * m


# ---------------------------------------------------------------------------
# Weight preparation (hoisted out of the per-call path)
# ---------------------------------------------------------------------------
class PreparedParams(NamedTuple):
    w1: jax.Array          # (d_in, d_hid)    bf16
    b1: jax.Array          # (1, d_hid)       f32
    w2: jax.Array          # (d_hid, n_embd)  bf16
    b2: jax.Array          # (1, n_embd)      f32
    w3: jax.Array          # (n_embd, V_pad)  bf16, zero-padded vocab lanes
    vocab_size: int        # true V (static)


def prepare_params(params):
    """One-time weight prep: bf16 cast + vocab padding. Call once, reuse."""
    w1, b1, w2, b2, w3 = params
    d_in, d_hid = w1.shape
    n_embd, V = w3.shape
    V_pad = _round_up(V, 128)
    w3p = w3 if V_pad == V else jnp.pad(w3, ((0, 0), (0, V_pad - V)))
    return PreparedParams(
        w1=jnp.asarray(w1, jnp.bfloat16),
        b1=jnp.asarray(b1, jnp.float32).reshape(1, d_hid),
        w2=jnp.asarray(w2, jnp.bfloat16),
        b2=jnp.asarray(b2, jnp.float32).reshape(1, n_embd),
        w3=jnp.asarray(w3p, jnp.bfloat16),
        vocab_size=int(V),
    )


# ---------------------------------------------------------------------------
# Shared MLP body (bf16 MXU operands, f32 accumulation, f32 elementwise)
# ---------------------------------------------------------------------------
def _compute_y(x_ref, w1_ref, b1_ref, w2_ref, b2_ref):
    h = jnp.dot(x_ref[...], w1_ref[...],
                preferred_element_type=jnp.float32) + b1_ref[...]
    # GELU (tanh approximation), f32 on VPU/EUP
    h = 0.5 * h * (1.0 + jnp.tanh(h * (_C_GELU + _C_GELU3 * (h * h))))
    return jnp.dot(h.astype(jnp.bfloat16), w2_ref[...],
                   preferred_element_type=jnp.float32) + b2_ref[...]


# ---------------------------------------------------------------------------
# Kernel A: fused MLP + online-LSE cross-entropy (grid = (M tiles, V tiles))
# ---------------------------------------------------------------------------
def _make_fused_kernel(M, V, V_pad, tm, tv, with_logits):
    def kernel(x_ref, tgt_ref, w1_ref, b1_ref, w2_ref, b2_ref, w3_ref, *outs):
        if with_logits:
            logits_ref, loss_ref, y_sc, m_sc, l_sc, p_sc = outs
        else:
            loss_ref, y_sc, m_sc, l_sc, p_sc = outs

        i = pl.program_id(0)          # M-tile index ("parallel")
        v = pl.program_id(1)          # V-tile index ("arbitrary", innermost)
        nv = pl.num_programs(1)

        # ---- c_fc + GELU + c_proj once per row tile; cache y in VMEM ----
        @pl.when(v == 0)
        def _():
            y_sc[...] = _compute_y(x_ref, w1_ref, b1_ref, w2_ref, b2_ref
                                   ).astype(y_sc.dtype)
            m_sc[...] = jnp.full_like(m_sc, -jnp.inf)
            l_sc[...] = jnp.zeros_like(l_sc)
            p_sc[...] = jnp.zeros_like(p_sc)

        # ---- lm_head for this vocab tile (MXU, f32 accumulation) ----
        logits = jnp.dot(y_sc[...], w3_ref[...],
                         preferred_element_type=jnp.float32)       # (tm, tv) f32
        if with_logits:
            logits_ref[...] = logits.astype(logits_ref.dtype)      # bf16 writeback

        # ---- online log-sum-exp epilogue (~3 passes over (tm, tv)) ----
        col = jax.lax.broadcasted_iota(jnp.int32, (tm, tv), 1) + v * tv
        z = jnp.where(col < V, logits, -1e30) if V_pad != V else logits
        m_prev = m_sc[...]
        m_new = jnp.maximum(m_prev, jnp.max(z, axis=-1, keepdims=True))
        l_sc[...] = (jnp.exp(m_prev - m_new) * l_sc[...]
                     + jnp.sum(jnp.exp(z - m_new), axis=-1, keepdims=True))
        m_sc[...] = m_new
        # picked target logit straight from the raw (un-shifted) logits
        p_sc[...] += jnp.sum(jnp.where(col == tgt_ref[...], logits, 0.0),
                             axis=-1, keepdims=True)

        # ---- finalize per-tile partial loss on the last vocab tile ----
        @pl.when(v == nv - 1)
        def _():
            row_loss = m_sc[...] + jnp.log(l_sc[...]) - p_sc[...]   # (tm, 1)
            row = jax.lax.broadcasted_iota(jnp.int32, (tm, 1), 0)
            row_loss = jnp.where(i * tm + row < M, row_loss, 0.0)   # drop pad rows
            loss_ref[...] = jnp.broadcast_to(
                jnp.sum(row_loss).reshape(1, 1, 1), (1, 8, 128))

    return kernel


# ---------------------------------------------------------------------------
# Kernel B: logits only (no targets)
# ---------------------------------------------------------------------------
def _make_logits_kernel():
    def kernel(x_ref, w1_ref, b1_ref, w2_ref, b2_ref, w3_ref, logits_ref, y_sc):
        v = pl.program_id(1)

        @pl.when(v == 0)
        def _():
            y_sc[...] = _compute_y(x_ref, w1_ref, b1_ref, w2_ref, b2_ref
                                   ).astype(y_sc.dtype)

        logits_ref[...] = jnp.dot(y_sc[...], w3_ref[...],
                                  preferred_element_type=jnp.float32
                                  ).astype(logits_ref.dtype)
    return kernel


# ---------------------------------------------------------------------------
# Tile / VMEM planning
# ---------------------------------------------------------------------------
def _vmem_budget_bytes():
    cap = 64 * 2 ** 20                               # conservative default (v7x)
    try:
        info = pltpu.get_tpu_info()
        cap = int(getattr(info, "vmem_capacity_bytes", cap))
    except Exception:
        pass
    budget = max(cap - 16 * 2 ** 20, 24 * 2 ** 20)   # planning budget
    limit = max(cap - 8 * 2 ** 20, budget)           # scoped VMEM limit
    return budget, limit


def _estimate_vmem_bytes(tm, tv, d_in, d_hid, n_embd, logits_bytes, fused):
    dbl = 2                                          # pipeline double-buffering
    weights = dbl * (2 * d_in * d_hid + 4 * d_hid
                     + 2 * d_hid * n_embd + 4 * n_embd)
    w3_tile = dbl * 2 * n_embd * tv
    x_tile = dbl * 2 * tm * max(d_in, 128)
    out_tile = dbl * logits_bytes * tm * tv
    y_scratch = 2 * tm * max(n_embd, 128)
    interm = 4 * tm * max(d_hid, 128) + 4 * tm * tv + 4 * tm * max(n_embd, 128)
    extra = 0
    if fused:
        extra += dbl * 4 * tm * 128                  # targets (lane-padded i32)
        extra += 3 * 4 * tm * 128                    # m / l / picked scratch
        extra += dbl * 4 * 8 * 128                   # partial-loss block
        extra += 2 * 4 * tm * tv                     # CE epilogue temporaries
    return weights + w3_tile + x_tile + out_tile + y_scratch + interm + extra


def _select_tiles(V_pad, d_in, d_hid, n_embd, logits_bytes, fused, budget,
                  tv_hint=None):
    tv_cands = ([tv_hint] if tv_hint else
                [c for c in range(min(V_pad, 2048), 127, -128) if V_pad % c == 0])
    tm_cands = [512, 256, 128, 64, 32, 16]
    for tm_c in tm_cands:                            # prefer big row tiles first
        for tv_c in tv_cands:                        # then big vocab tiles
            if _estimate_vmem_bytes(tm_c, tv_c, d_in, d_hid, n_embd,
                                    logits_bytes, fused) <= budget:
                return tm_c, tv_c
    return tm_cands[-1], tv_cands[-1]


def _snap_tm(M, tm):
    """Snap tm to a multiple-of-16 divisor of M (avoids pad rows + strip copy)."""
    if M <= tm:
        return M, M
    t16 = max(16, (tm // 16) * 16)
    for cand in range(t16, 15, -16):
        if M % cand == 0:
            return cand, M
    return t16, _round_up(M, t16)


# ---------------------------------------------------------------------------
# Python wrapper
# ---------------------------------------------------------------------------
def dynamics_forward(forward_embedding, backward_goal, params, targets=None, *,
                     return_logits=True, logits_dtype=None, tm=None, tv=None):
    """Pallas implementation of Dynamics.forward.

    `params` may be a raw (w1, b1, w2, b2, w3) tuple or a PreparedParams
    (pass PreparedParams to avoid re-casting / re-padding weights every call).
    In the training path logits are returned as bf16 by default (set
    `logits_dtype=jnp.float32` to override, or `return_logits=False` to skip
    the logits HBM writeback entirely).
    """
    if not isinstance(params, PreparedParams):
        params = prepare_params(params)
    w1b, b1f, w2b, b2f, w3p, V = params

    B, T, n_f_enc = forward_embedding.shape
    n_goal = backward_goal.shape[-1]
    d_in, d_hid = w1b.shape
    n_embd = w2b.shape[1]
    V_pad = w3p.shape[1]
    assert d_in == n_f_enc + n_goal, "c_fc input dim mismatch"

    fused = targets is not None
    if logits_dtype is None:
        logits_dtype = jnp.bfloat16 if fused else jnp.float32
    want_logits = bool(return_logits) or not fused
    logits_bytes = jnp.dtype(logits_dtype).itemsize if want_logits else 0

    M = B * T
    budget, vmem_limit = _vmem_budget_bytes()

    # ---- tile selection (per-generation VMEM budget) ----
    tv_hint = None
    if tv is not None:
        tv_hint = int(tv) if V_pad % int(tv) == 0 else 128
    tm_sel, tv_blk = _select_tiles(V_pad, d_in, d_hid, n_embd, logits_bytes,
                                   fused, budget, tv_hint=tv_hint)
    if tm is not None:
        tm_blk = int(tm)
        M_pad = _round_up(M, tm_blk)
    else:
        tm_blk, M_pad = _snap_tm(M, tm_sel)
    grid_m = M_pad // tm_blk
    grid_v = V_pad // tv_blk

    # ---- activations: concat once, bf16, pad rows only if unavoidable ----
    x2d = jnp.concatenate([forward_embedding, backward_goal], axis=-1)
    x2d = x2d.reshape(M, d_in).astype(jnp.bfloat16)
    if M_pad != M:
        x2d = jnp.pad(x2d, ((0, M_pad - M), (0, 0)))

    # ---- BlockSpecs: activations tiled over M, weights resident, W3 streamed over V ----
    x_spec = pl.BlockSpec((tm_blk, d_in), lambda i, v: (i, 0))
    w_specs = [
        pl.BlockSpec((d_in, d_hid), lambda i, v: (0, 0)),
        pl.BlockSpec((1, d_hid), lambda i, v: (0, 0)),
        pl.BlockSpec((d_hid, n_embd), lambda i, v: (0, 0)),
        pl.BlockSpec((1, n_embd), lambda i, v: (0, 0)),
        pl.BlockSpec((n_embd, tv_blk), lambda i, v: (0, v)),
    ]
    compiler_params = pltpu.CompilerParams(
        dimension_semantics=("parallel", "arbitrary"),   # M megacore-shardable
        vmem_limit_bytes=int(vmem_limit))

    loss = None
    logits2d = None
    if fused:
        tgt2d = targets.reshape(M, 1).astype(jnp.int32)
        if M_pad != M:
            tgt2d = jnp.pad(tgt2d, ((0, M_pad - M), (0, 0)))

        kernel = _make_fused_kernel(M, V, V_pad, tm_blk, tv_blk, want_logits)
        out_shape, out_specs = [], []
        if want_logits:
            out_shape.append(jax.ShapeDtypeStruct((M_pad, V_pad), logits_dtype))
            out_specs.append(pl.BlockSpec((tm_blk, tv_blk), lambda i, v: (i, v)))
        out_shape.append(jax.ShapeDtypeStruct((grid_m, 8, 128), jnp.float32))
        out_specs.append(pl.BlockSpec((1, 8, 128), lambda i, v: (i, 0, 0)))

        results = pl.pallas_call(
            kernel,
            grid=(grid_m, grid_v),
            out_shape=tuple(out_shape),
            in_specs=[x_spec, pl.BlockSpec((tm_blk, 1), lambda i, v: (i, 0))]
                     + w_specs,
            out_specs=tuple(out_specs),
            scratch_shapes=[
                pltpu.VMEM((tm_blk, n_embd), jnp.bfloat16),   # cached y (c_proj out)
                pltpu.VMEM((tm_blk, 1), jnp.float32),          # running max
                pltpu.VMEM((tm_blk, 1), jnp.float32),          # running sum-exp
                pltpu.VMEM((tm_blk, 1), jnp.float32),          # picked target logit
            ],
            compiler_params=compiler_params,
        )(x2d, tgt2d, w1b, b1f, w2b, b2f, w3p)

        if want_logits:
            logits2d, loss_part = results
        else:
            (loss_part,) = results
        loss = jnp.sum(loss_part[:, 0, 0]) * (1.0 / M)
    else:
        logits2d = pl.pallas_call(
            _make_logits_kernel(),
            grid=(grid_m, grid_v),
            out_shape=jax.ShapeDtypeStruct((M_pad, V_pad), logits_dtype),
            in_specs=[x_spec] + w_specs,
            out_specs=pl.BlockSpec((tm_blk, tv_blk), lambda i, v: (i, v)),
            scratch_shapes=[pltpu.VMEM((tm_blk, n_embd), jnp.bfloat16)],
            compiler_params=compiler_params,
        )(x2d, w1b, b1f, w2b, b2f, w3p)

    logits = None
    if logits2d is not None:
        lg = logits2d
        if M_pad != M or V_pad != V:
            # TODO(synk): at production sizes align vocab to 128 and B*T to tm so
            # this strip-copy of the largest tensor disappears entirely.
            lg = lg[:M, :V]
        logits = lg.reshape(B, T, V)
    return logits, loss


# ---------------------------------------------------------------------------
# Init + pure-JAX reference (same bf16-operand / f32-accumulate numerics)
# ---------------------------------------------------------------------------
def init_params(key, n_f_enc, n_goal, n_embd, vocab_size):
    """Mirror _init_weights: N(0, 0.02) weights, zero biases."""
    d_in = n_f_enc + n_goal
    d_hid = 4 * n_embd
    k1, k2, k3 = jax.random.split(key, 3)
    std = 0.02
    w1 = std * jax.random.normal(k1, (d_in, d_hid), dtype=jnp.float32)
    b1 = jnp.zeros((1, d_hid), dtype=jnp.float32)
    w2 = std * jax.random.normal(k2, (d_hid, n_embd), dtype=jnp.float32)
    b2 = jnp.zeros((1, n_embd), dtype=jnp.float32)
    w3 = std * jax.random.normal(k3, (n_embd, vocab_size), dtype=jnp.float32)
    return (w1, b1, w2, b2, w3)


def dynamics_ref(forward_embedding, backward_goal, params, targets=None):
    w1, b1, w2, b2, w3 = params
    bf = lambda a: a.astype(jnp.bfloat16)
    x = jnp.concatenate([forward_embedding, backward_goal], axis=-1)
    h = jnp.dot(bf(x), bf(w1), preferred_element_type=jnp.float32) + b1.reshape(1, -1)
    c = math.sqrt(2.0 / math.pi)
    h = 0.5 * h * (1.0 + jnp.tanh(c * (h + 0.044715 * h ** 3)))
    y = jnp.dot(bf(h), bf(w2), preferred_element_type=jnp.float32) + b2.reshape(1, -1)
    logits = jnp.dot(bf(y), bf(w3), preferred_element_type=jnp.float32)
    loss = None
    if targets is not None:
        V = logits.shape[-1]
        lg = logits.reshape(-1, V)
        t = targets.reshape(-1)
        lse = jax.scipy.special.logsumexp(lg, axis=-1)
        picked = jnp.take_along_axis(lg, t[:, None], axis=-1)[:, 0]
        loss = jnp.mean(lse - picked)
    return logits, loss


if __name__ == "__main__":
    key = jax.random.PRNGKey(0)

    # ---- config 1: vocab padding/masking path (V=64 -> V_pad=128) ----
    B, T, n_f_enc, n_goal, n_embd, vocab = 2, 8, 16, 16, 32, 64
    k1, k2, k3, k4, key = jax.random.split(key, 5)
    fe = jax.random.normal(k1, (B, T, n_f_enc), dtype=jnp.float32)
    bg = jax.random.normal(k2, (B, T, n_goal), dtype=jnp.float32)
    tg = jax.random.randint(k3, (B, T), 0, vocab, dtype=jnp.int32)
    params = init_params(k4, n_f_enc, n_goal, n_embd, vocab)
    prepared = prepare_params(params)          # weight prep hoisted, done once

    ref_logits, ref_loss = dynamics_ref(fe, bg, params, tg)

    # training path (fused CE, bf16 logits writeback)
    logits, loss = dynamics_forward(fe, bg, prepared, tg)
    jax.block_until_ready((logits, loss))
    assert logits.shape == (B, T, vocab)
    assert jnp.allclose(logits.astype(jnp.float32), ref_logits, atol=2e-3, rtol=2e-2), \
        float(jnp.max(jnp.abs(logits.astype(jnp.float32) - ref_logits)))
    assert jnp.allclose(loss, ref_loss, atol=1e-3, rtol=1e-3), \
        (float(loss), float(ref_loss))

    # training path, loss only (logits HBM writeback skipped entirely)
    lg_none, loss_nl = dynamics_forward(fe, bg, prepared, tg, return_logits=False)
    jax.block_until_ready(loss_nl)
    assert lg_none is None
    assert jnp.allclose(loss_nl, ref_loss, atol=1e-3, rtol=1e-3)

    # inference path (f32 logits, no targets)
    logits_inf, loss_inf = dynamics_forward(fe, bg, prepared, None)
    jax.block_until_ready(logits_inf)
    assert loss_inf is None
    assert jnp.allclose(logits_inf, ref_logits, atol=1e-3, rtol=1e-3)

    # forced multi-tile M (grid_m > 1): per-tile partial-loss reduction path
    logits_mt, loss_mt = dynamics_forward(fe, bg, prepared, tg, tm=8)
    jax.block_until_ready((logits_mt, loss_mt))
    assert jnp.allclose(loss_mt, ref_loss, atol=1e-3, rtol=1e-3)
    assert jnp.allclose(logits_mt.astype(jnp.float32), ref_logits, atol=2e-3, rtol=2e-2)

    # ---- config 2: multi-tile vocab axis (grid_v > 1, online LSE across tiles) ----
    B2, T2, vocab2 = 2, 4, 300                 # V_pad = 384, tv=128 -> 3 vocab tiles
    k1, k2, k3, k4, key = jax.random.split(key, 5)
    fe2 = jax.random.normal(k1, (B2, T2, n_f_enc), dtype=jnp.float32)
    bg2 = jax.random.normal(k2, (B2, T2, n_goal), dtype=jnp.float32)
    tg2 = jax.random.randint(k3, (B2, T2), 0, vocab2, dtype=jnp.int32)
    params2 = init_params(k4, n_f_enc, n_goal, n_embd, vocab2)
    prepared2 = prepare_params(params2)
    ref_logits2, ref_loss2 = dynamics_ref(fe2, bg2, params2, tg2)

    logits_v, loss_v = dynamics_forward(fe2, bg2, prepared2, tg2, tv=128)
    jax.block_until_ready((logits_v, loss_v))
    assert logits_v.shape == (B2, T2, vocab2)
    assert jnp.allclose(logits_v.astype(jnp.float32), ref_logits2, atol=2e-3, rtol=2e-2)
    assert jnp.allclose(loss_v, ref_loss2, atol=1e-3, rtol=1e-3), \
        (float(loss_v), float(ref_loss2))

    print("KERNEL_OK")
</pallas_src>

<mosaic_0001>
module attributes {stable_mosaic.version = 11 : i64} {
  func.func @kernel(%arg0: i32, %arg1: i32, %arg2: memref<16x32xbf16, #tpu.memory_space<vmem>>, %arg3: memref<16x1xi32, #tpu.memory_space<vmem>>, %arg4: memref<32x128xbf16, #tpu.memory_space<vmem>>, %arg5: memref<1x128xf32, #tpu.memory_space<vmem>>, %arg6: memref<128x32xbf16, #tpu.memory_space<vmem>>, %arg7: memref<1x32xf32, #tpu.memory_space<vmem>>, %arg8: memref<32x128xbf16, #tpu.memory_space<vmem>>, %arg9: memref<16x128xbf16, #tpu.memory_space<vmem>>, %arg10: memref<1x8x128xf32, #tpu.memory_space<vmem>>, %arg11: memref<16x32xbf16, #tpu.memory_space<vmem>>, %arg12: memref<16x1xf32, #tpu.memory_space<vmem>>, %arg13: memref<16x1xf32, #tpu.memory_space<vmem>>, %arg14: memref<16x1xf32, #tpu.memory_space<vmem>>) attributes {dimension_semantics = [#tpu.dimension_semantics<parallel>, #tpu.dimension_semantics<arbitrary>], iteration_bounds = array<i64: 1, 1>, scalar_prefetch = 0 : i64, scratch_operands = 4 : i64, tpu.core_type = #tpu.core_type<tc>, window_params = [{transform_indices = @transform_0, window_bounds = array<i64: 16, 32>}, {transform_indices = @transform_1, window_bounds = array<i64: 16, 1>}, {pipeline_mode = #tpu.pipeline_mode<synchronous>, transform_indices = @transform_2, window_bounds = array<i64: 32, 128>}, {pipeline_mode = #tpu.pipeline_mode<synchronous>, transform_indices = @transform_3, window_bounds = array<i64: 1, 128>}, {pipeline_mode = #tpu.pipeline_mode<synchronous>, transform_indices = @transform_4, window_bounds = array<i64: 128, 32>}, {pipeline_mode = #tpu.pipeline_mode<synchronous>, transform_indices = @transform_5, window_bounds = array<i64: 1, 32>}, {transform_indices = @transform_6, window_bounds = array<i64: 32, 128>}, {transform_indices = @transform_7, window_bounds = array<i64: 16, 128>}, {transform_indices = @transform_8, window_bounds = array<i64: 1, 8, 128>}]} {
    %c0_i32 = arith.constant 0 : i32
    %0 = arith.cmpi eq, %arg1, %c0_i32 : i32
    %1 = arith.extui %0 : i1 to i32
    %c0_i32_0 = arith.constant 0 : i32
    %2 = arith.cmpi ne, %1, %c0_i32_0 : i32
    scf.if %2 {
      %c0_27 = arith.constant 0 : index
      %c0_28 = arith.constant 0 : index
      %45 = vector.load %arg2[%c0_27, %c0_28] : memref<16x32xbf16, #tpu.memory_space<vmem>>, vector<16x32xbf16>
      %c0_29 = arith.constant 0 : index
      %c0_30 = arith.constant 0 : index
      %46 = vector.load %arg4[%c0_29, %c0_30] : memref<32x128xbf16, #tpu.memory_space<vmem>>, vector<32x128xbf16>
      %cst_31 = arith.constant dense<0.000000e+00> : vector<16x128xf32>
      %47 = tpu.matmul %45, %46, %cst_31 {dimension_numbers = #tpu.dot_dimension_numbers<[1], [0], [0], [1], [0, 0, 1, 1], [], []>} : vector<16x32xbf16>, vector<32x128xbf16>, vector<16x128xf32> -> vector<16x128xf32>
      %c0_32 = arith.constant 0 : index
      %c0_33 = arith.constant 0 : index
      %48 = vector.load %arg5[%c0_32, %c0_33] : memref<1x128xf32, #tpu.memory_space<vmem>>, vector<1x128xf32>
      %49 = vector.broadcast %48 : vector<1x128xf32> to vector<16x128xf32>
      %50 = arith.addf %47, %49 : vector<16x128xf32>
      %cst_34 = arith.constant 5.000000e-01 : f32
      %51 = vector.broadcast %cst_34 : f32 to vector<16x128xf32>
      %52 = arith.mulf %51, %50 : vector<16x128xf32>
      %53 = arith.mulf %50, %50 : vector<16x128xf32>
      %cst_35 = arith.constant 0.0356774069 : f32
      %54 = vector.broadcast %cst_35 : f32 to vector<16x128xf32>
      %55 = arith.mulf %54, %53 : vector<16x128xf32>
      %cst_36 = arith.constant 0.797884583 : f32
      %56 = vector.broadcast %cst_36 : f32 to vector<16x128xf32>
      %57 = arith.addf %56, %55 : vector<16x128xf32>
      %58 = arith.mulf %50, %57 : vector<16x128xf32>
      %59 = math.tanh %58 : vector<16x128xf32>
      %cst_37 = arith.constant 1.000000e+00 : f32
      %60 = vector.broadcast %cst_37 : f32 to vector<16x128xf32>
      %61 = arith.addf %60, %59 : vector<16x128xf32>
      %62 = arith.mulf %52, %61 : vector<16x128xf32>
      %63 = arith.truncf %62 : vector<16x128xf32> to vector<16x128xbf16>
      %c0_38 = arith.constant 0 : index
      %c0_39 = arith.constant 0 : index
      %64 = vector.load %arg6[%c0_38, %c0_39] : memref<128x32xbf16, #tpu.memory_space<vmem>>, vector<128x32xbf16>
      %cst_40 = arith.constant dense<0.000000e+00> : vector<16x32xf32>
      %65 = tpu.matmul %63, %64, %cst_40 {dimension_numbers = #tpu.dot_dimension_numbers<[1], [0], [0], [1], [0, 0, 1, 1], [], []>} : vector<16x128xbf16>, vector<128x32xbf16>, vector<16x32xf32> -> vector<16x32xf32>
      %c0_41 = arith.constant 0 : index
      %c0_42 = arith.constant 0 : index
      %66 = vector.load %arg7[%c0_41, %c0_42] : memref<1x32xf32, #tpu.memory_space<vmem>>, vector<1x32xf32>
      %67 = vector.broadcast %66 : vector<1x32xf32> to vector<16x32xf32>
      %68 = arith.addf %65, %67 : vector<16x32xf32>
      %69 = arith.truncf %68 : vector<16x32xf32> to vector<16x32xbf16>
      %c0_43 = arith.constant 0 : index
      %c0_44 = arith.constant 0 : index
      %70 = vector.load %arg11[%c0_43, %c0_44] : memref<16x32xbf16, #tpu.memory_space<vmem>>, vector<16x32xbf16>
      tpu.vector_store %arg11[%c0_43, %c0_44], %69 {strides = array<i32>} : memref<16x32xbf16, #tpu.memory_space<vmem>>, vector<16x32xbf16>,
      %cst_45 = arith.constant 0xFF800000 : f32
      %71 = vector.broadcast %cst_45 : f32 to vector<16x1xf32>
      %c0_46 = arith.constant 0 : index
      %c0_47 = arith.constant 0 : index
      %72 = vector.load %arg12[%c0_46, %c0_47] : memref<16x1xf32, #tpu.memory_space<vmem>>, vector<16x1xf32>
      tpu.vector_store %arg12[%c0_46, %c0_47], %71 {strides = array<i32>} : memref<16x1xf32, #tpu.memory_space<vmem>>, vector<16x1xf32>,
      %cst_48 = arith.constant 0.000000e+00 : f32
      %73 = vector.broadcast %cst_48 : f32 to vector<16x1xf32>
      %c0_49 = arith.constant 0 : index
      %c0_50 = arith.constant 0 : index
      %74 = vector.load %arg13[%c0_49, %c0_50] : memref<16x1xf32, #tpu.memory_space<vmem>>, vector<16x1xf32>
      tpu.vector_store %arg13[%c0_49, %c0_50], %73 {strides = array<i32>} : memref<16x1xf32, #tpu.memory_space<vmem>>, vector<16x1xf32>,
      %cst_51 = arith.constant 0.000000e+00 : f32
      %75 = vector.broadcast %cst_51 : f32 to vector<16x1xf32>
      %c0_52 = arith.constant 0 : index
      %c0_53 = arith.constant 0 : index
      %76 = vector.load %arg14[%c0_52, %c0_53] : memref<16x1xf32, #tpu.memory_space<vmem>>, vector<16x1xf32>
      tpu.vector_store %arg14[%c0_52, %c0_53], %75 {strides = array<i32>} : memref<16x1xf32, #tpu.memory_space<vmem>>, vector<16x1xf32>,
    } else {
    }
    %c0 = arith.constant 0 : index
    %c0_1 = arith.constant 0 : index
    %3 = vector.load %arg11[%c0, %c0_1] : memref<16x32xbf16, #tpu.memory_space<vmem>>, vector<16x32xbf16>
    %c0_2 = arith.constant 0 : index
    %c0_3 = arith.constant 0 : index
    %4 = vector.load %arg8[%c0_2, %c0_3] : memref<32x128xbf16, #tpu.memory_space<vmem>>, vector<32x128xbf16>
    %cst = arith.constant dense<0.000000e+00> : vector<16x128xf32>
    %5 = tpu.matmul %3, %4, %cst {dimension_numbers = #tpu.dot_dimension_numbers<[1], [0], [0], [1], [0, 0, 1, 1], [], []>} : vector<16x32xbf16>, vector<32x128xbf16>, vector<16x128xf32> -> vector<16x128xf32>
    %6 = arith.truncf %5 : vector<16x128xf32> to vector<16x128xbf16>
    %c0_4 = arith.constant 0 : index
    %c0_5 = arith.constant 0 : index
    %7 = vector.load %arg9[%c0_4, %c0_5] : memref<16x128xbf16, #tpu.memory_space<vmem>>, vector<16x128xbf16>
    tpu.vector_store %arg9[%c0_4, %c0_5], %6 {strides = array<i32>} : memref<16x128xbf16, #tpu.memory_space<vmem>>, vector<16x128xbf16>,
    %8 = tpu.iota {dimensions = array<i32: 1>} : vector<16x128xi32>
    %c128_i32 = arith.constant 128 : i32
    %9 = arith.muli %arg1, %c128_i32 : i32
    %10 = vector.broadcast %9 : i32 to vector<16x128xi32>
    %11 = arith.addi %8, %10 : vector<16x128xi32>
    %c64_i32 = arith.constant 64 : i32
    %12 = vector.broadcast %c64_i32 : i32 to vector<16x128xi32>
    %13 = arith.cmpi slt, %11, %12 : vector<16x128xi32>
    %cst_6 = arith.constant -1.000000e+30 : f32
    %14 = vector.broadcast %cst_6 : f32 to vector<16x128xf32>
    %15 = arith.select %13, %5, %14 : vector<16x128xi1>, vector<16x128xf32>
    %c0_7 = arith.constant 0 : index
    %c0_8 = arith.constant 0 : index
    %16 = vector.load %arg12[%c0_7, %c0_8] : memref<16x1xf32, #tpu.memory_space<vmem>>, vector<16x1xf32>
    %cst_9 = arith.constant dense<0xFF800000> : vector<16xf32>
    %17 = vector.multi_reduction <maximumf>, %15, %cst_9 [1] : vector<16x128xf32> to vector<16xf32>
    %18 = vector.shape_cast %17 : vector<16xf32> to vector<16x1xf32>
    %19 = arith.maximumf %16, %18 : vector<16x1xf32>
    %20 = arith.subf %16, %19 : vector<16x1xf32>
    %21 = math.exp %20 : vector<16x1xf32>
    %c0_10 = arith.constant 0 : index
    %c0_11 = arith.constant 0 : index
    %22 = vector.load %arg13[%c0_10, %c0_11] : memref<16x1xf32, #tpu.memory_space<vmem>>, vector<16x1xf32>
    %23 = arith.mulf %21, %22 : vector<16x1xf32>
    %24 = vector.broadcast %19 : vector<16x1xf32> to vector<16x128xf32>
    %25 = arith.subf %15, %24 : vector<16x128xf32>
    %26 = math.exp %25 : vector<16x128xf32>
    %cst_12 = arith.constant dense<0.000000e+00> : vector<16xf32>
    %27 = vector.multi_reduction <add>, %26, %cst_12 [1] : vector<16x128xf32> to vector<16xf32>
    %28 = vector.shape_cast %27 : vector<16xf32> to vector<16x1xf32>
    %29 = arith.addf %23, %28 : vector<16x1xf32>
    %c0_13 = arith.constant 0 : index
    %c0_14 = arith.constant 0 : index
    %30 = vector.load %arg13[%c0_13, %c0_14] : memref<16x1xf32, #tpu.memory_space<vmem>>, vector<16x1xf32>
    tpu.vector_store %arg13[%c0_13, %c0_14], %29 {strides = array<i32>} : memref<16x1xf32, #tpu.memory_space<vmem>>, vector<16x1xf32>,
    %c0_15 = arith.constant 0 : index
    %c0_16 = arith.constant 0 : index
    %31 = vector.load %arg12[%c0_15, %c0_16] : memref<16x1xf32, #tpu.memory_space<vmem>>, vector<16x1xf32>
    tpu.vector_store %arg12[%c0_15, %c0_16], %19 {strides = array<i32>} : memref<16x1xf32, #tpu.memory_space<vmem>>, vector<16x1xf32>,
    %c0_17 = arith.constant 0 : index
    %c0_18 = arith.constant 0 : index
    %32 = vector.load %arg14[%c0_17, %c0_18] : memref<16x1xf32, #tpu.memory_space<vmem>>, vector<16x1xf32>
    %c0_19 = arith.constant 0 : index
    %c0_20 = arith.constant 0 : index
    %33 = vector.load %arg3[%c0_19, %c0_20] : memref<16x1xi32, #tpu.memory_space<vmem>>, vector<16x1xi32>
    %34 = vector.broadcast %33 : vector<16x1xi32> to vector<16x128xi32>
    %35 = arith.cmpi eq, %11, %34 : vector<16x128xi32>
    %cst_21 = arith.constant 0.000000e+00 : f32
    %36 = vector.broadcast %cst_21 : f32 to vector<16x128xf32>
    %37 = arith.select %35, %5, %36 : vector<16x128xi1>, vector<16x128xf32>
    %cst_22 = arith.constant dense<0.000000e+00> : vector<16xf32>
    %38 = vector.multi_reduction <add>, %37, %cst_22 [1] : vector<16x128xf32> to vector<16xf32>
    %39 = vector.shape_cast %38 : vector<16xf32> to vector<16x1xf32>
    %40 = arith.addf %32, %39 : vector<16x1xf32>
    %c0_23 = arith.constant 0 : index
    %c0_24 = arith.constant 0 : index
    %41 = vector.load %arg14[%c0_23, %c0_24] : memref<16x1xf32, #tpu.memory_space<vmem>>, vector<16x1xf32>
    tpu.vector_store %arg14[%c0_23, %c0_24], %40 {strides = array<i32>} : memref<16x1xf32, #tpu.memory_space<vmem>>, vector<16x1xf32>,
    %c0_i32_25 = arith.constant 0 : i32
    %42 = arith.cmpi eq, %arg1, %c0_i32_25 : i32
    %43 = arith.extui %42 : i1 to i32
    %c0_i32_26 = arith.constant 0 : i32
    %44 = arith.cmpi ne, %43, %c0_i32_26 : i32
    scf.if %44 {
      %c0_27 = arith.constant 0 : index
      %c0_28 = arith.constant 0 : index
      %45 = vector.load %arg12[%c0_27, %c0_28] : memref<16x1xf32, #tpu.memory_space<vmem>>, vector<16x1xf32>
      %c0_29 = arith.constant 0 : index
      %c0_30 = arith.constant 0 : index
      %46 = vector.load %arg13[%c0_29, %c0_30] : memref<16x1xf32, #tpu.memory_space<vmem>>, vector<16x1xf32>
      %47 = math.log %46 : vector<16x1xf32>
      %48 = arith.addf %45, %47 : vector<16x1xf32>
      %c0_31 = arith.constant 0 : index
      %c0_32 = arith.constant 0 : index
      %49 = vector.load %arg14[%c0_31, %c0_32] : memref<16x1xf32, #tpu.memory_space<vmem>>, vector<16x1xf32>
      %50 = arith.subf %48, %49 : vector<16x1xf32>
      %51 = tpu.iota {dimensions = array<i32: 0>} : vector<16x1xi32>
      %c16_i32 = arith.constant 16 : i32
      %52 = arith.muli %arg0, %c16_i32 : i32
      %53 = vector.broadcast %52 : i32 to vector<16x1xi32>
      %54 = arith.addi %53, %51 : vector<16x1xi32>
      %c16_i32_33 = arith.constant 16 : i32
      %55 = vector.broadcast %c16_i32_33 : i32 to vector<16x1xi32>
      %56 = arith.cmpi slt, %54, %55 : vector<16x1xi32>
      %cst_34 = arith.constant 0.000000e+00 : f32
      %57 = vector.broadcast %cst_34 : f32 to vector<16x1xf32>
      %58 = arith.select %56, %50, %57 : vector<16x1xi1>, vector<16x1xf32>
      %59 = vector.shape_cast %58 : vector<16x1xf32> to vector<1x16x1xf32>
      %cst_35 = arith.constant dense<0.000000e+00> : vector<1xf32>
      %60 = vector.multi_reduction <add>, %59, %cst_35 [1, 2] : vector<1x16x1xf32> to vector<1xf32>
      %61 = vector.shape_cast %60 : vector<1xf32> to vector<1x1x1xf32>
      %62 = vector.extract %61[0, 0, 0] : f32 from vector<1x1x1xf32>
      %63 = vector.broadcast %62 : f32 to vector<1x1x1xf32>
      %64 = vector.shape_cast %63 : vector<1x1x1xf32> to vector<1x1x1xf32>
      %65 = vector.broadcast %64 : vector<1x1x1xf32> to vector<1x8x128xf32>
      %c0_36 = arith.constant 0 : index
      %c0_37 = arith.constant 0 : index
      %c0_38 = arith.constant 0 : index
      %66 = vector.load %arg10[%c0_36, %c0_37, %c0_38] : memref<1x8x128xf32, #tpu.memory_space<vmem>>, vector<1x8x128xf32>
      tpu.vector_store %arg10[%c0_36, %c0_37, %c0_38], %65 {strides = array<i32>} : memref<1x8x128xf32, #tpu.memory_space<vmem>>, vector<1x8x128xf32>,
    } else {
    }
    return
  }
  func.func @transform_0(%arg0: i32, %arg1: i32) -> (i32, i32) {
    %c0_i32 = arith.constant 0 : i32
    %c0_i32_0 = arith.constant 0 : i32
    return %arg0, %c0_i32 : i32, i32
  }
  func.func @transform_1(%arg0: i32, %arg1: i32) -> (i32, i32) {
    %c0_i32 = arith.constant 0 : i32
    %c0_i32_0 = arith.constant 0 : i32
    return %arg0, %c0_i32 : i32, i32
  }
  func.func @transform_2(%arg0: i32, %arg1: i32) -> (i32, i32) {
    %c0_i32 = arith.constant 0 : i32
    %c0_i32_0 = arith.constant 0 : i32
    %c0_i32_1 = arith.constant 0 : i32
    return %c0_i32, %c0_i32_0 : i32, i32
  }
  func.func @transform_3(%arg0: i32, %arg1: i32) -> (i32, i32) {
    %c0_i32 = arith.constant 0 : i32
    %c0_i32_0 = arith.constant 0 : i32
    %c0_i32_1 = arith.constant 0 : i32
    return %c0_i32, %c0_i32_0 : i32, i32
  }
  func.func @transform_4(%arg0: i32, %arg1: i32) -> (i32, i32) {
    %c0_i32 = arith.constant 0 : i32
    %c0_i32_0 = arith.constant 0 : i32
    %c0_i32_1 = arith.constant 0 : i32
    return %c0_i32, %c0_i32_0 : i32, i32
  }
  func.func @transform_5(%arg0: i32, %arg1: i32) -> (i32, i32) {
    %c0_i32 = arith.constant 0 : i32
    %c0_i32_0 = arith.constant 0 : i32
    %c0_i32_1 = arith.constant 0 : i32
    return %c0_i32, %c0_i32_0 : i32, i32
  }
  func.func @transform_6(%arg0: i32, %arg1: i32) -> (i32, i32) {
    %c0_i32 = arith.constant 0 : i32
    %c0_i32_0 = arith.constant 0 : i32
    return %c0_i32, %arg1 : i32, i32
  }
  func.func @transform_7(%arg0: i32, %arg1: i32) -> (i32, i32) {
    %c0_i32 = arith.constant 0 : i32
    return %arg0, %arg1 : i32, i32
  }
  func.func @transform_8(%arg0: i32, %arg1: i32) -> (i32, i32, i32) {
    %c0_i32 = arith.constant 0 : i32
    %c0_i32_0 = arith.constant 0 : i32
    %c0_i32_1 = arith.constant 0 : i32
    return %arg0, %c0_i32, %c0_i32_0 : i32, i32, i32
  }
}

</mosaic_0001>

<bundles_post_ra>
// kernel: tpu_custom_call.1
= control target key start
LH: loop header
LB: loop body
LE: loop exit
PB: predicated region body
PF: predicated region fallthrough
CT: control target
= control target key end

     0   :  { %14 = vsyncpa [#allocation7], 0  ;;  %v633_v1 = vmov 0.0   ;;  %vm634_vm0 = vmmov 0   ;;  %vm65_vm1 = vcmask 261120   ;;  %s797_s0 = inlined_call_operand.vmem [shape: bf16[16,32], index: 0, kind: input, shape index: {}]   ;;  %s798_s1 = inlined_call_operand.vmem [shape: s32[16,1], index: 1, kind: input, shape index: {}]   ;;  %s799_s2 = inlined_call_operand.vmem [shape: bf16[32,128], index: 2, kind: input, shape index: {}]   ;;  %s800_s3 = inlined_call_operand.vmem [shape: f32[1,128], index: 3, kind: input, shape index: {}]   ;;  %s801_s4 = inlined_call_operand.vmem [shape: bf16[128,32], index: 4, kind: input, shape index: {}]   ;;  %s802_s5 = inlined_call_operand.vmem [shape: f32[1,32], index: 5, kind: input, shape index: {}]   ;;  %s803_s6 = inlined_call_operand.vmem [shape: bf16[32,128], index: 6, kind: input, shape index: {}]   ;;  %s804_s7 = inlined_call_operand.hbm [shape: bf16[16,128], index: 7, kind: output, shape index: {0}]   ;;  %s805_s8 = inlined_call_operand.hbm [shape: f32[1,8,128], index: 8, kind: output, shape index: {1}]  }
   0x1   :  { %v556_v0 = vld [vmem:[%s799_s2] sm:$0xff]   ;;  %508 = vmatprep.subr.bf16.mxu0 %v633_v1  ;;  %516 = vmatprep.subr.bf16.mxu1 %v633_v1  ;;  %v557_v2 = vld [vmem:[%s799_s2 + $0x8] sm:$0xff]  }
   0x2   :  { %509 = vmatpush3.bf16.msra.mxu0 %v556_v0  ;;  %512 = vmatprep.mubr.msk.bf16.mxu0 %vm634_vm0, %v633_v1  ;;  %v559_v3 = vld [vmem:[%s801_s4] sm:$0xff]  }
   0x3   :  { %510 = vmatprep.subr.bf16.mxu0 %v633_v1  ;;  %532 = vmatprep.mubr.msk.bf16.mxu1 %vm634_vm0, %v633_v1  ;;  %v558_v4 = vld [vmem:[%s797_s0] sm:$0xff]  }
   0x4   :  { %517 = vmatpush3.bf16.msra.mxu1 %v559_v3 }
   0x5   :  { %518 = vmatprep.subr.bf16.mxu1 %v633_v1 }
   0x6   :  { %511 = vmatpush3.bf16.msra.mxu0 %v557_v2 }
   0x7   :  { %536 = vmatprep.subr.bf16.mxu0 %v633_v1 }
   0x9   :  { %513 = vmatmul.mubr.msk.bf16.vlgmr.msra.gmra.mrb[0].mxu0 %vm65_vm1, %v558_v4 }
   0xa   :  { %540 = vmatprep.mubr.msk.bf16.mxu0 %vm634_vm0, %v633_v1 }
   0xb   :  { %15 = vsyncpa [#allocation9], 0  ;;  %v560_v5 = vld [vmem:[%s801_s4 + $0x8] sm:$0xff]   ;;  %v561_v6 = vld [vmem:[%s801_s4 + $0x10] sm:$0xff]   ;;  %v635_v47 = vmov 0   ;;  %vm241_vm2 = vcmask 7168   ;;  %v320_v49 = vlaneseq }
   0xc   :  { %519 = vmatpush3.bf16.msra.mxu1 %v560_v5  ;;  %v562_v7 = vld [vmem:[%s801_s4 + $0x18] sm:$0xff]   ;;  %v563_v8 = vld [vmem:[%s801_s4 + $0x20] sm:$0xff]   ;;  %v564_v9 = vld [vmem:[%s801_s4 + $0x28] sm:$0xff]   ;;  %555 = vset.pattern.permute.xlu0 %v635_v47  ;;  %v636_v48 = vmov -inf   ;;  %244 = vst.msk [vmem:[#allocation4] sm:$0xff] %vm241_vm2, %v633_v1 }
   0xd   :  { %520 = vmatprep.subr.bf16.mxu1 %v633_v1  ;;  %v565_v10 = vld [vmem:[%s801_s4 + $0x30] sm:$0xff]   ;;  %v566_v11 = vld [vmem:[%s801_s4 + $0x38] sm:$0xff]   ;;  %v467_v12 = vld [vmem:[%s800_s3] ss:$0 sm:$0xff]  ;;  %554 = vset.pattern.permute.xlu1 %v635_v47  ;;  %242 = vst.msk [vmem:[#allocation3] sm:$0xff] %vm241_vm2, %v636_v48  ;;  %v321_v50 = vand.u32 127, %v320_v49 }
   0xe   :  { %v567_v36 = vld [vmem:[%s803_s6] sm:$0xff]   ;;  %v568_v37 = vld [vmem:[%s803_s6 + $0x8] sm:$0xff]   ;;  %243 = vst.msk [vmem:[#allocation3 + $0x8] sm:$0xff] %vm241_vm2, %v636_v48  ;;  %245 = vst.msk [vmem:[#allocation4 + $0x8] sm:$0xff] %vm241_vm2, %v633_v1 }
   0xf   :  { %537 = vmatpush3.bf16.msra.mxu0 %v567_v36  ;;  %v472_v38 = vld [vmem:[%s802_s5] ss:$0 sm:$0xff]  ;;  %246 = vst.msk [vmem:[#allocation5] sm:$0xff] %vm241_vm2, %v633_v1  ;;  %247 = vst.msk [vmem:[#allocation5 + $0x8] sm:$0xff] %vm241_vm2, %v633_v1  ;;  %vm325_vm3 = vcmp.lt.s32.totalorder %v321_v50, 64  ;;  %v376_v3 = vld [vmem:[%s798_s1 + $0x8] sm:$0xff] }
  0x10   :  { %521 = vmatpush3.bf16.msra.mxu1 %v561_v6  ;;  %538 = vmatprep.subr.bf16.mxu0 %v633_v1  ;;  %v375_v58 = vld [vmem:[%s798_s1] sm:$0xff]  ;;  %s637_s1 = smov [#allocation6]  }
  0x11   :  { %522 = vmatprep.subr.bf16.mxu1 %v633_v1  ;;  %s442_s11 = sshll.u32 %s637_s1, 4  ;;  %s443_s11 = int_to_ptr.vmem [resolvable:$true] %s442_s11 }
  0x12   :  { %s585_s12 = scalar_lea.vmem %s443_s11, 128  ;;  %p590_p1 = scmp.lt.s32.totalorder %s443_s11, %s443_s11 }
  0x13   :  { %539 = vmatpush3.bf16.msra.mxu0 %v568_v37  ;;  %p586_p0 = scmp.ne.s32.totalorder %s443_s11, %s585_s12  ;;  %p591_p2 = scmp.lt.s32.totalorder %s585_s12, %s585_s12 }
  0x14   :  { %523 = vmatpush3.bf16.msra.mxu1 %v562_v7  ;;  %v328_v59 = vld [vmem:[#allocation3] sm:$0xff] }
  0x15   :  { %524 = vmatprep.subr.bf16.mxu1 %v633_v1  ;;  %v329_v62 = vld [vmem:[#allocation3 + $0x8] sm:$0xff]  ;;  %p592_p3 = por %p591_p2, %p590_p1 }
  0x17   :  { %p593_p4 = pnand %p592_p3, %p586_p0 }
  0x18   :  { %525 = vmatpush3.bf16.msra.mxu1 %v563_v8 }
  0x19   :  { %526 = vmatprep.subr.bf16.mxu1 %v633_v1 }
  0x1c   :  { %527 = vmatpush3.bf16.msra.mxu1 %v564_v9 }
  0x1d   :  { %528 = vmatprep.subr.bf16.mxu1 %v633_v1 }
  0x20   :  { %529 = vmatpush3.bf16.msra.mxu1 %v565_v10 }
  0x21   :  { %530 = vmatprep.subr.bf16.mxu1 %v633_v1 }
  0x24   :  { %531 = vmatpush3.bf16.msra.mxu1 %v566_v11 }
  0xdc   :  { %v103_v13 = vpop.f32.mrb[0].mxu0 }
  0xdd   :  { %v104_v14 = vadd.f32 %v467_v12, %v103_v13  ;;  %v514_v15 = vpop.f32.mrb[1].mxu0 }
  0xde   :  { %v106_v16 = vpop.f32.mrb[2].mxu0 }
  0xdf   :  { %v112_v17 = vmul.f32 %v104_v14, %v104_v14  ;;  %v107_v18 = vadd.f32 %v467_v12, %v106_v16  ;;  %v515_v19 = vpop.f32.mrb[3].mxu0  ;;  %v110_v30 = vmul.f32 0.5, %v104_v14  ;;  %v373_v16 = vld [vmem:[#allocation5] sm:$0xff] }
  0xe1   :  { %v114_v20 = vmul.f32 0.035677407, %v112_v17  ;;  %v113_v21 = vmul.f32 %v107_v18, %v107_v18  ;;  %v111_v31 = vmul.f32 0.5, %v107_v18 }
  0xe3   :  { %v116_v22 = vadd.f32 0.7978846, %v114_v20  ;;  %v115_v23 = vmul.f32 0.035677407, %v113_v21 }
  0xe5   :  { %v118_v24 = vmul.f32 %v116_v22, %v104_v14  ;;  %v117_v25 = vadd.f32 0.7978846, %v115_v23  ;;  %v342_v22 = vld [vmem:[#allocation4] sm:$0xff] }
  0xe7   :  { %569 = vtanh.f32 %v118_v24  ;;  %v119_v26 = vmul.f32 %v117_v25, %v107_v18 }
  0xe9   :  { %571 = vtanh.f32 %v119_v26  ;;  %v343_v26 = vld [vmem:[#allocation4 + $0x8] sm:$0xff] }
  0xf1   :  { %v570_v27 = vpop.eup %569 }
  0xf2   :  { %v122_v28 = vadd.f32 1.0, %v570_v27 }
  0xf3   :  { %v572_v29 = vpop.eup %571 }
  0xf4   :  { %v123_v32 = vadd.f32 1.0, %v572_v29  ;;  %v124_v33 = vmul.f32 %v122_v28, %v110_v30 }
  0xf6   :  { %v125_v34 = vmul.f32 %v123_v32, %v111_v31  ;;  %v374_v31 = vld [vmem:[#allocation5 + $0x8] sm:$0xff] }
  0xf8   :  { %v126_v35 = vpack.c.bf16 %v125_v34, %v124_v33 }
  0xfa   :  { %533 = vmatmul.mubr.bf16.vlgmr.msra.gmra.mrb[0].mxu1 %v126_v35 }
 0x1cd   :  { %v232_v39 = vpop.f32.mrb[0].mxu1 }
 0x1ce   :  { %v534_v40 = vpop.f32.mrb[1].mxu1  ;;  %v233_v42 = vadd.f32 %v472_v38, %v232_v39 }
 0x1cf   :  { %v235_v41 = vpop.f32.mrb[2].mxu1 }
 0x1d0   :  { %v236_v43 = vadd.f32 %v472_v38, %v235_v41  ;;  %v535_v44 = vpop.f32.mrb[3].mxu1 }
 0x1d2   :  { %v239_v45 = vpack.c.bf16 %v236_v43, %v233_v42 }
 0x1d4   :  { %240 = vst.msk [vmem:[#allocation2] sm:$0xff] %vm65_vm1, %v239_v45 }
 0x1db   :  { %v248_v46 = vld [vmem:[#allocation2] sm:$0xff] }
 0x1dc   :  { %541 = vmatmul.mubr.msk.bf16.vlgmr.msra.gmra.mrb[4].mxu0 %vm65_vm1, %v248_v46 }
 0x2af   :  { %v303_v51 = vpop.f32.mrb[4].mxu0 }
 0x2b0   :  { %v542_v52 = vpop.f32.mrb[5].mxu0  ;;  %v326_v53 = vsel %vm325_vm3, %v303_v51, -1e+30 }
 0x2b1   :  { %330 = vmax.xlane.f32.xlu0 %v326_v53  ;;  %v306_v54 = vpop.f32.mrb[6].mxu0 }
 0x2b2   :  { %v491_v55 = vpack.c.bf16 %v306_v54, %v303_v51  ;;  %v543_v56 = vpop.f32.mrb[7].mxu0  ;;  %v327_v57 = vsel %vm325_vm3, %v306_v54, -1e+30 }
 0x2b4   :  { %492 = vst [vmem:[#allocation6] sm:$0xff] %v491_v55  }
 0x2b5   :  { %332 = vmax.xlane.f32.xlu0 %v327_v57 }
 0x2cb   :  { %378 = vperm.xlu0 %555, %v375_v58  }
 0x33e   :  { %v331_v60 = vpop.xlane.xlu0 %330 }
 0x33f   :  { %v334_v61 = vmax.f32 %v328_v59, %v331_v60 }
 0x341   :  { %v336_v63 = vsub.f32 %v328_v59, %v334_v61  ;;  %371 = vst.msk [vmem:[#allocation3] sm:$0xff] %vm241_vm2, %v334_v61  ;;  %348 = vperm.xlu1 %554, %v334_v61  }
 0x342   :  { %v333_v0 = vpop.xlane.xlu0 %332 }
 0x343   :  { %v335_v1 = vmax.f32 %v329_v62, %v333_v0  ;;  %v338_v19 = vmul.f32 1.442695, %v336_v63 }
 0x345   :  { %v337_v2 = vsub.f32 %v329_v62, %v335_v1  ;;  %372 = vst.msk [vmem:[#allocation3 + $0x8] sm:$0xff] %vm241_vm2, %v335_v1  ;;  %353 = vperm.xlu1 %554, %v335_v1  }
 0x347   :  { %v340_v20 = vmul.f32 1.442695, %v337_v2 }
 0x348   :  { %v398_v38 = vld [vmem:[#allocation3] sm:$0xff] }
 0x349   :  { %381 = vperm.xlu1 %554, %v376_v3  }
 0x34a   :  { %v379_v4 = vpop.permute.xlu0 %378 }
 0x34b   :  { %vm383_vm4 = vcmp.eq.s32.totalorder %v321_v50, %v379_v4 }
 0x34c   :  { %v385_v5 = vsel %vm383_vm4, %v303_v51, 0.0  ;;  %v399_v42 = vld [vmem:[#allocation3 + $0x8] sm:$0xff] }
 0x34d   :  { %387 = vadd.xlane.f32.xlu0 %v385_v5 }
 0x3c0   :  { %v349_v6 = vpop.permute.xlu1 %348 }
 0x3c1   :  { %v356_v7 = vsub.f32 %v326_v53, %v349_v6 }
 0x3c3   :  { %v358_v8 = vmul.f32 1.442695, %v356_v7 }
 0x3c4   :  { %v354_v9 = vpop.permute.xlu1 %353 }
 0x3c5   :  { %573 = vpow2.f32 %v358_v8  ;;  %v357_v10 = vsub.f32 %v327_v57, %v354_v9 }
 0x3c7   :  { %v360_v11 = vmul.f32 1.442695, %v357_v10 }
 0x3c8   :  { %v382_v13 = vpop.permute.xlu1 %381 }
 0x3c9   :  { %575 = vpow2.f32 %v360_v11  ;;  %vm384_vm5 = vcmp.eq.s32.totalorder %v321_v50, %v382_v13 }
 0x3ca   :  { %v386_v15 = vsel %vm384_vm5, %v306_v54, 0.0  ;;  %577 = vpow2.f32 %v338_v19 }
 0x3cb   :  { %579 = vpow2.f32 %v340_v20 }
 0x3cf   :  { %v574_v12 = vpop.eup %573 }
 0x3d0   :  { %362 = vadd.xlane.f32.xlu1 %v574_v12 }
 0x3d3   :  { %v576_v14 = vpop.eup %575 }
 0x3d4   :  { %364 = vadd.xlane.f32.xlu1 %v576_v14  ;;  %v578_v21 = vpop.eup %577 }
 0x3d5   :  { %v344_v23 = vmul.f32 %v578_v21, %v342_v22  ;;  %v580_v24 = vpop.eup %579 }
 0x3d6   :  { %v345_v28 = vmul.f32 %v580_v24, %v343_v26 }
 0x3d8   :  { %389 = vadd.xlane.f32.xlu1 %v386_v15 }
 0x3da   :  { %v388_v17 = vpop.xlane.xlu0 %387 }
 0x3db   :  { %v391_v18 = vadd.f32 %v388_v17, %v373_v16 }
 0x3dd   :  { %393 = vst.msk [vmem:[#allocation5] sm:$0xff] %vm241_vm2, %v391_v18 }
 0x3e4   :  { %v408_v43 = vld [vmem:[#allocation5] sm:$0xff] }
 0x45d   :  { %v363_v25 = vpop.xlane.xlu1 %362 }
 0x45e   :  { %v366_v27 = vadd.f32 %v363_v25, %v344_v23 }
 0x460   :  { %369 = vst.msk [vmem:[#allocation4] sm:$0xff] %vm241_vm2, %v366_v27 }
 0x461   :  { %v365_v29 = vpop.xlane.xlu1 %364 }
 0x462   :  { %v367_v30 = vadd.f32 %v365_v29, %v345_v28 }
 0x464   :  { %370 = vst.msk [vmem:[#allocation4 + $0x8] sm:$0xff] %vm241_vm2, %v367_v30 }
 0x465   :  { %v390_v32 = vpop.xlane.xlu1 %389 }
 0x466   :  { %v392_v33 = vadd.f32 %v390_v32, %v374_v31 }
 0x467   :  { %v400_v34 = vld [vmem:[#allocation4] sm:$0xff] }
 0x468   :  { %394 = vst.msk [vmem:[#allocation5 + $0x8] sm:$0xff] %vm241_vm2, %v392_v33  ;;  %581 = vlog2.f32 %v400_v34 }
 0x46b   :  { %v401_v35 = vld [vmem:[#allocation4 + $0x8] sm:$0xff] }
 0x46c   :  { %583 = vlog2.f32 %v401_v35 }
 0x46f   :  { %v409_v46 = vld [vmem:[#allocation5 + $0x8] sm:$0xff] }
 0x472   :  { %v582_v36 = vpop.eup %581 }
 0x473   :  { %v403_v37 = vmul.f32 0.6931472, %v582_v36 }
 0x475   :  { %v406_v39 = vadd.f32 %v403_v37, %v398_v38 }
 0x476   :  { %v584_v40 = vpop.eup %583 }
 0x477   :  { %v405_v41 = vmul.f32 0.6931472, %v584_v40  ;;  %v410_v45 = vsub.f32 %v406_v39, %v408_v43 }
 0x479   :  { %v407_v44 = vadd.f32 %v405_v41, %v399_v42  ;;  %v423_v48 = vsel %vm241_vm2, %v410_v45, 0.0 }
 0x47b   :  { %v411_v47 = vsub.f32 %v407_v44, %v409_v46 }
 0x47d   :  { %v424_v49 = vsel %vm241_vm2, %v411_v47, 0.0 }
 0x47e   :  { %v425_v50 = vadd.f32 %v424_v49, %v423_v48 }
 0x480   :  { %426 = vadd.xlane.f32.xlu1 %v425_v50 }
 0x481   :  { %596 = shalt.err (!%p593_p4)
}
 0x482   :  { %s597_s0 = scalar_lea.hbm %s804_s7, 128 }
 0x483   :  { %p598_p5 = scmp.ne.s32.totalorder %s804_s7, %s597_s0  ;;  %p601_p6 = scmp.lt.u32.totalorder %s597_s0, %s804_s7 }
 0x485   :  { %p603_p7 = pnand %p601_p6, %p598_p5 }
 0x487   :  { %606 = shalt.err (!%p603_p7)
}
 0x488   :  { %s638_s18 = smov 64   ;;  %s639_s19 = smov 4  }
 0x489   :  { %448 = dma.vmem_to_hbm [thread:$0]  %s443_s11, 128, %s804_s7, [#allocation7], %s638_s18, %s638_s18, %s639_s19  }
 0x48a   :  { %s640_s22 = smov [#allocation8]  }
 0x48b   :  { %s455_s23 = sshll.u32 %s640_s22, 4  ;;  %s456_s23 = int_to_ptr.vmem [resolvable:$true] %s455_s23 }
 0x48c   :  { %s607_s25 = scalar_lea.vmem %s456_s23, 128  ;;  %p612_p9 = scmp.lt.s32.totalorder %s456_s23, %s456_s23 }
 0x48d   :  { %p608_p8 = scmp.ne.s32.totalorder %s456_s23, %s607_s25  ;;  %p613_p10 = scmp.lt.s32.totalorder %s607_s25, %s607_s25 }
 0x48f   :  { %p614_p11 = por %p613_p10, %p612_p9 }
 0x491   :  { %p615_p12 = pnand %p614_p11, %p608_p8 }
 0x50d   :  { %v427_v51 = vpop.xlane.xlu1 %426 }
 0x50e   :  { %v428_v52 = vrot.slane %v427_v51, 4 }
 0x510   :  { %v429_v53 = vadd.f32 %v428_v52, %v427_v51 }
 0x512   :  { %v430_v54 = vrot.slane %v429_v53, 2 }
 0x514   :  { %v431_v55 = vadd.f32 %v430_v54, %v429_v53 }
 0x516   :  { %v432_v56 = vrot.slane %v431_v55, 1 }
 0x518   :  { %v433_v57 = vadd.f32 %v432_v56, %v431_v55 }
 0x51a   :  { %544 = vpush %v433_v57 }
 0x54b   :  { %s545_s24 = spop %544 }
 0x54c   :  { %v435_v58 = vstv %s545_s24 }
 0x54d   :  { %436 = vst [vmem:[#allocation8] sm:$0xff] %v435_v58 }
 0x54e   :  { %618 = shalt.err (!%p615_p12)
}
 0x54f   :  { %s619_s3 = scalar_lea.hbm %s805_s8, 128 }
 0x550   :  { %p620_p13 = scmp.ne.s32.totalorder %s805_s8, %s619_s3  ;;  %p623_p0 = scmp.lt.u32.totalorder %s619_s3, %s805_s8 }
 0x552   :  { %p625_p1 = pnand %p623_p0, %p620_p13 }
 0x554   :  { %628 = shalt.err (!%p625_p1)
}
 0x555   :  { %458 = dma.vmem_to_hbm [thread:$0]  %s456_s23, 128, %s805_s8, [#allocation9]  }
 0x556   :  { %629 = dma.done.wait [#allocation7], 128  }
 0x557   :  { %630 = vsyncadd [#allocation7], 4294967168 }
 0x558   :  { %631 = dma.done.wait [#allocation9], 128  }
 0x559   :  { %632 = vsyncadd [#allocation9], 4294967168 }
 0x55a   :  { %465 = vsyncpa [#allocation7], 1 }
 0x55b   :  { %466 = vsyncpa [#allocation9], 1 }

</bundles_post_ra>
